<compile_context>
chip_gen: v7x
topology: tpu7x:2x2x1
jax: 0.10.0
libtpu: 0.0.40
codegen_flags: <defaults>
</compile_context>

<pallas_src>
import functools

import jax
import jax.numpy as jnp
from jax import lax
from jax.experimental import pallas as pl
from jax.experimental.pallas import tpu as pltpu

# torch nn.LSTM gate order is (i, f, g, o); we repack to (i, f, o, g) so the
# three sigmoid gates are contiguous.
_GATE_PERM = (0, 1, 3, 2)


def _lstm_tagger_kernel(T, B, Hp, x_ref, wih_ref, whh_ref, b_ref, wt_ref,
                        bt_ref, out_ref, gx_sc, hseq_sc):
    """Whole LSTMTagger forward in one invocation.

    x_ref   : (T*B, E)      bf16  flattened embeddings (T = "time", B = batch)
    wih_ref : (E, 4*Hp)     bf16  pre-transposed, gate-reordered (i,f,o,g),
                                  each gate zero-padded to Hp lanes
    whh_ref : (Hp, 4*Hp)    bf16  pre-transposed recurrent weights, padded
    b_ref   : (1, 4*Hp)     f32   b_ih + b_hh, padded with zeros
    wt_ref  : (Hp, TSp)     bf16  hidden2tag weight, zero-padded
    bt_ref  : (1, TSp)      f32   hidden2tag bias, padded with -1e30
    out_ref : (T*B, TSp)    f32   log-softmax tag scores (lane-dense)
    gx_sc   : (T*B, 4*Hp)   f32   precomputed input projection
    hseq_sc : (T*B, Hp)     f32   per-step hidden states (full-vreg stores)
    """
    # ---- Preamble: input projection for every step (off the serial path) ---
    gx_sc[...] = (jnp.dot(x_ref[...], wih_ref[...],
                          preferred_element_type=jnp.float32)
                  + b_ref[...])                                   # (T*B, 4*Hp)

    # ---- Serial recurrence: only h @ W_hh + nonlinearities per step --------
    def step(t, carry):
        h_bf, c = carry                                 # (B,Hp) bf16 / f32
        sl = pl.ds(pl.multiple_of(t * B, B), B)
        gates = gx_sc[sl, :] + jnp.dot(h_bf, whh_ref[...],
                                       preferred_element_type=jnp.float32)
        # Gate order (i, f, o, g): one sigmoid over a contiguous 3-gate span,
        # every slice starts on a 128-lane boundary (full vregs).
        ifo = jax.nn.sigmoid(gates[:, 0:3 * Hp])
        i_g = ifo[:, 0 * Hp:1 * Hp]
        f_g = ifo[:, 1 * Hp:2 * Hp]
        o_g = ifo[:, 2 * Hp:3 * Hp]
        g_g = jnp.tanh(gates[:, 3 * Hp:4 * Hp])
        c_new = f_g * c + i_g * g_g                     # f32 elementwise state
        h_new = o_g * jnp.tanh(c_new)
        hseq_sc[sl, :] = h_new                          # full-vreg lane-dense
        return (h_new.astype(jnp.bfloat16), c_new)      # one cast, reused

    h0 = jnp.zeros((B, Hp), jnp.bfloat16)
    c0 = jnp.zeros((B, Hp), jnp.float32)
    lax.fori_loop(0, T, step, (h0, c0), unroll=True)    # T is tiny here

    # ---- Epilogue: batched hidden2tag + log_softmax (one shot) -------------
    hs = hseq_sc[...].astype(jnp.bfloat16)                         # (T*B, Hp)
    tag = jnp.dot(hs, wt_ref[...], preferred_element_type=jnp.float32) \
        + bt_ref[...]                                              # (T*B, TSp)
    m = jnp.max(tag, axis=-1, keepdims=True)        # pad lanes hold -1e30
    shifted = tag - m
    lse = jnp.log(jnp.sum(jnp.exp(shifted), axis=-1, keepdims=True))
    out_ref[...] = (shifted - lse).astype(out_ref.dtype)


def _pack_gate_weight(w, H, Hp, rows_out):
    """(4H, Din) torch gate order (i,f,g,o) -> (rows_out, 4*Hp) bf16,
    transposed, gate order (i,f,o,g), zero-padded per gate / per row."""
    Din = w.shape[1]
    w4 = w.reshape(4, H, Din)[jnp.array(_GATE_PERM)]            # (4, H, Din)
    blk = jnp.zeros((4, Hp, rows_out), jnp.float32).at[:, :H, :Din].set(w4)
    return (jnp.transpose(blk, (2, 0, 1))
            .reshape(rows_out, 4 * Hp).astype(jnp.bfloat16))


def _pack_gate_bias(b_ih, b_hh, H, Hp):
    b4 = (b_ih + b_hh).reshape(4, H)[jnp.array(_GATE_PERM)]
    out = jnp.zeros((4, Hp), jnp.float32).at[:, :H].set(b4)
    return out.reshape(1, 4 * Hp)


def lstm_tagger_forward(indices, emb_table, w_ih, w_hh, b_ih, b_hh,
                        w_tag, b_tag):
    """indices: (batch_size, SENTENCE_LEN) int32 word ids."""
    embeds = emb_table[indices]                         # (T, B, E) gather=glue
    T, B, E = embeds.shape
    H = w_hh.shape[1]
    TS = w_tag.shape[0]
    Hp = ((H + 127) // 128) * 128                       # lane-aligned gates
    TS_pad = ((TS + 127) // 128) * 128                  # lane-dense output

    x_flat = embeds.reshape(T * B, E).astype(jnp.bfloat16)
    wih_p = _pack_gate_weight(w_ih, H, Hp, E)           # (E,  4*Hp) bf16
    whh_p = _pack_gate_weight(w_hh, H, Hp, Hp)          # (Hp, 4*Hp) bf16
    b_p = _pack_gate_bias(b_ih, b_hh, H, Hp)            # (1,  4*Hp) f32
    wt_pad = (jnp.zeros((Hp, TS_pad), jnp.float32)
              .at[:H, :TS].set(w_tag.T).astype(jnp.bfloat16))
    # Pad bias with a huge negative so padded lanes never affect log_softmax.
    bt_pad = jnp.full((1, TS_pad), -1e30, jnp.float32).at[0, :TS].set(
        b_tag.astype(jnp.float32))

    kernel = functools.partial(_lstm_tagger_kernel, T, B, Hp)

    out_flat = pl.pallas_call(
        kernel,
        out_shape=jax.ShapeDtypeStruct((T * B, TS_pad), jnp.float32),
        in_specs=[pl.BlockSpec(memory_space=pltpu.MemorySpace.VMEM)] * 6,
        out_specs=pl.BlockSpec(memory_space=pltpu.MemorySpace.VMEM),
        scratch_shapes=[pltpu.VMEM((T * B, 4 * Hp), jnp.float32),
                        pltpu.VMEM((T * B, Hp), jnp.float32)],
        compiler_params=pltpu.CompilerParams(
            vmem_limit_bytes=32 * 1024 * 1024),
    )(x_flat, wih_p, whh_p, b_p, wt_pad, bt_pad)

    return out_flat.reshape(T, B, TS_pad)[:, :, :TS]


def reference_forward(indices, emb_table, w_ih, w_hh, b_ih, b_hh,
                      w_tag, b_tag):
    """Pure-JAX reference mirroring torch.nn.LSTM + Linear + log_softmax."""
    embeds = emb_table[indices]                          # (T, B, E)
    T, B, E = embeds.shape
    H = w_hh.shape[1]

    def step(carry, x_t):
        h, c = carry
        gates = x_t @ w_ih.T + h @ w_hh.T + b_ih + b_hh
        i = jax.nn.sigmoid(gates[:, 0 * H:1 * H])
        f = jax.nn.sigmoid(gates[:, 1 * H:2 * H])
        g = jnp.tanh(gates[:, 2 * H:3 * H])
        o = jax.nn.sigmoid(gates[:, 3 * H:4 * H])
        c = f * c + i * g
        h = o * jnp.tanh(c)
        return (h, c), h

    init = (jnp.zeros((B, H), jnp.float32), jnp.zeros((B, H), jnp.float32))
    _, hs = jax.lax.scan(step, init, embeds)             # (T, B, H)
    tag = hs @ w_tag.T + b_tag
    return jax.nn.log_softmax(tag, axis=-1)


if __name__ == "__main__":
    # Small, self-consistent shapes implied by the module's forward().
    batch_size = 4        # "time" axis of the (misused) LSTM
    sentence_len = 8      # LSTM batch axis
    embedding_dim = 16
    hidden_dim = 32
    vocab_size = 30
    target_size = 5

    key = jax.random.PRNGKey(0)
    ks = jax.random.split(key, 8)

    indices = jax.random.randint(ks[0], (batch_size, sentence_len),
                                 0, vocab_size, dtype=jnp.int32)
    emb_table = jax.random.normal(ks[1], (vocab_size, embedding_dim),
                                  jnp.float32)
    scale = 1.0 / jnp.sqrt(hidden_dim)
    w_ih = scale * jax.random.normal(ks[2], (4 * hidden_dim, embedding_dim),
                                     jnp.float32)
    w_hh = scale * jax.random.normal(ks[3], (4 * hidden_dim, hidden_dim),
                                     jnp.float32)
    b_ih = scale * jax.random.normal(ks[4], (4 * hidden_dim,), jnp.float32)
    b_hh = scale * jax.random.normal(ks[5], (4 * hidden_dim,), jnp.float32)
    w_tag = scale * jax.random.normal(ks[6], (target_size, hidden_dim),
                                      jnp.float32)
    b_tag = scale * jax.random.normal(ks[7], (target_size,), jnp.float32)

    out = lstm_tagger_forward(indices, emb_table, w_ih, w_hh, b_ih, b_hh,
                              w_tag, b_tag)
    out = jax.block_until_ready(out)

    ref = reference_forward(indices, emb_table, w_ih, w_hh, b_ih, b_hh,
                            w_tag, b_tag)
    assert out.shape == (batch_size, sentence_len, target_size)
    assert jnp.allclose(out, ref, atol=5e-2, rtol=5e-2)

    print("KERNEL_OK")
</pallas_src>

<mosaic_0001>
module attributes {stable_mosaic.version = 11 : i64} {
  func.func @_lstm_tagger_kernel(%arg0: memref<32x16xbf16, #tpu.memory_space<vmem>>, %arg1: memref<16x512xbf16, #tpu.memory_space<vmem>>, %arg2: memref<128x512xbf16, #tpu.memory_space<vmem>>, %arg3: memref<1x512xf32, #tpu.memory_space<vmem>>, %arg4: memref<128x128xbf16, #tpu.memory_space<vmem>>, %arg5: memref<1x128xf32, #tpu.memory_space<vmem>>, %arg6: memref<32x128xf32, #tpu.memory_space<vmem>>, %arg7: memref<32x512xf32, #tpu.memory_space<vmem>>, %arg8: memref<32x128xf32, #tpu.memory_space<vmem>>) attributes {dimension_semantics = [], scalar_prefetch = 0 : i64, scratch_operands = 2 : i64, tpu.core_type = #tpu.core_type<tc>} {
    %c0 = arith.constant 0 : index
    %c0_0 = arith.constant 0 : index
    %0 = vector.load %arg0[%c0, %c0_0] : memref<32x16xbf16, #tpu.memory_space<vmem>>, vector<32x16xbf16>
    %c0_1 = arith.constant 0 : index
    %c0_2 = arith.constant 0 : index
    %1 = vector.load %arg1[%c0_1, %c0_2] : memref<16x512xbf16, #tpu.memory_space<vmem>>, vector<16x512xbf16>
    %cst = arith.constant dense<0.000000e+00> : vector<32x512xf32>
    %2 = tpu.matmul %0, %1, %cst {dimension_numbers = #tpu.dot_dimension_numbers<[1], [0], [0], [1], [0, 0, 1, 1], [], []>} : vector<32x16xbf16>, vector<16x512xbf16>, vector<32x512xf32> -> vector<32x512xf32>
    %c0_3 = arith.constant 0 : index
    %c0_4 = arith.constant 0 : index
    %3 = vector.load %arg3[%c0_3, %c0_4] : memref<1x512xf32, #tpu.memory_space<vmem>>, vector<1x512xf32>
    %4 = vector.broadcast %3 : vector<1x512xf32> to vector<32x512xf32>
    %5 = arith.addf %2, %4 : vector<32x512xf32>
    %c0_5 = arith.constant 0 : index
    %c0_6 = arith.constant 0 : index
    %6 = vector.load %arg7[%c0_5, %c0_6] : memref<32x512xf32, #tpu.memory_space<vmem>>, vector<32x512xf32>
    tpu.vector_store %arg7[%c0_5, %c0_6], %5 {strides = array<i32>} : memref<32x512xf32, #tpu.memory_space<vmem>>, vector<32x512xf32>,
    %cst_7 = arith.constant 0.000000e+00 : bf16
    %7 = vector.broadcast %cst_7 : bf16 to vector<8x128xbf16>
    %cst_8 = arith.constant 0.000000e+00 : f32
    %8 = vector.broadcast %cst_8 : f32 to vector<8x128xf32>
    %c0_i32 = arith.constant 0 : i32
    %c8_i32 = arith.constant 8 : i32
    %9 = arith.muli %c0_i32, %c8_i32 : i32
    %10 = tpu.assume_multiple %9, 8 : i32
    %11 = arith.index_cast %10 : i32 to index
    %c0_9 = arith.constant 0 : index
    %12 = vector.load %arg7[%11, %c0_9] : memref<32x512xf32, #tpu.memory_space<vmem>>, vector<8x512xf32>
    %c0_10 = arith.constant 0 : index
    %c0_11 = arith.constant 0 : index
    %13 = vector.load %arg2[%c0_10, %c0_11] : memref<128x512xbf16, #tpu.memory_space<vmem>>, vector<128x512xbf16>
    %cst_12 = arith.constant dense<0.000000e+00> : vector<8x512xf32>
    %14 = tpu.matmul %7, %13, %cst_12 {dimension_numbers = #tpu.dot_dimension_numbers<[1], [0], [0], [1], [0, 0, 1, 1], [], []>} : vector<8x128xbf16>, vector<128x512xbf16>, vector<8x512xf32> -> vector<8x512xf32>
    %15 = arith.addf %12, %14 : vector<8x512xf32>
    %16 = vector.extract_strided_slice %15 {offsets = [0, 0], sizes = [8, 384], strides = [1, 1]} : vector<8x512xf32> to vector<8x384xf32>
    %17 = arith.negf %16 : vector<8x384xf32>
    %18 = math.exp %17 : vector<8x384xf32>
    %cst_13 = arith.constant 1.000000e+00 : f32
    %19 = vector.broadcast %cst_13 : f32 to vector<8x384xf32>
    %20 = arith.addf %19, %18 : vector<8x384xf32>
    %21 = arith.divf %19, %20 : vector<8x384xf32>
    %22 = vector.extract_strided_slice %21 {offsets = [0, 0], sizes = [8, 128], strides = [1, 1]} : vector<8x384xf32> to vector<8x128xf32>
    %23 = vector.extract_strided_slice %21 {offsets = [0, 128], sizes = [8, 128], strides = [1, 1]} : vector<8x384xf32> to vector<8x128xf32>
    %24 = vector.extract_strided_slice %21 {offsets = [0, 256], sizes = [8, 128], strides = [1, 1]} : vector<8x384xf32> to vector<8x128xf32>
    %25 = vector.extract_strided_slice %15 {offsets = [0, 384], sizes = [8, 128], strides = [1, 1]} : vector<8x512xf32> to vector<8x128xf32>
    %26 = math.tanh %25 : vector<8x128xf32>
    %27 = arith.mulf %23, %8 : vector<8x128xf32>
    %28 = arith.mulf %22, %26 : vector<8x128xf32>
    %29 = arith.addf %27, %28 : vector<8x128xf32>
    %30 = math.tanh %29 : vector<8x128xf32>
    %31 = arith.mulf %24, %30 : vector<8x128xf32>
    %32 = arith.index_cast %10 : i32 to index
    %c0_14 = arith.constant 0 : index
    %33 = vector.load %arg8[%32, %c0_14] : memref<32x128xf32, #tpu.memory_space<vmem>>, vector<8x128xf32>
    tpu.vector_store %arg8[%32, %c0_14], %31 {strides = array<i32>} : memref<32x128xf32, #tpu.memory_space<vmem>>, vector<8x128xf32>,
    %34 = arith.truncf %31 : vector<8x128xf32> to vector<8x128xbf16>
    %c1_i32 = arith.constant 1 : i32
    %c8_i32_15 = arith.constant 8 : i32
    %35 = arith.muli %c1_i32, %c8_i32_15 : i32
    %36 = tpu.assume_multiple %35, 8 : i32
    %37 = arith.index_cast %36 : i32 to index
    %c0_16 = arith.constant 0 : index
    %38 = vector.load %arg7[%37, %c0_16] : memref<32x512xf32, #tpu.memory_space<vmem>>, vector<8x512xf32>
    %c0_17 = arith.constant 0 : index
    %c0_18 = arith.constant 0 : index
    %39 = vector.load %arg2[%c0_17, %c0_18] : memref<128x512xbf16, #tpu.memory_space<vmem>>, vector<128x512xbf16>
    %cst_19 = arith.constant dense<0.000000e+00> : vector<8x512xf32>
    %40 = tpu.matmul %34, %39, %cst_19 {dimension_numbers = #tpu.dot_dimension_numbers<[1], [0], [0], [1], [0, 0, 1, 1], [], []>} : vector<8x128xbf16>, vector<128x512xbf16>, vector<8x512xf32> -> vector<8x512xf32>
    %41 = arith.addf %38, %40 : vector<8x512xf32>
    %42 = vector.extract_strided_slice %41 {offsets = [0, 0], sizes = [8, 384], strides = [1, 1]} : vector<8x512xf32> to vector<8x384xf32>
    %43 = arith.negf %42 : vector<8x384xf32>
    %44 = math.exp %43 : vector<8x384xf32>
    %cst_20 = arith.constant 1.000000e+00 : f32
    %45 = vector.broadcast %cst_20 : f32 to vector<8x384xf32>
    %46 = arith.addf %45, %44 : vector<8x384xf32>
    %47 = arith.divf %45, %46 : vector<8x384xf32>
    %48 = vector.extract_strided_slice %47 {offsets = [0, 0], sizes = [8, 128], strides = [1, 1]} : vector<8x384xf32> to vector<8x128xf32>
    %49 = vector.extract_strided_slice %47 {offsets = [0, 128], sizes = [8, 128], strides = [1, 1]} : vector<8x384xf32> to vector<8x128xf32>
    %50 = vector.extract_strided_slice %47 {offsets = [0, 256], sizes = [8, 128], strides = [1, 1]} : vector<8x384xf32> to vector<8x128xf32>
    %51 = vector.extract_strided_slice %41 {offsets = [0, 384], sizes = [8, 128], strides = [1, 1]} : vector<8x512xf32> to vector<8x128xf32>
    %52 = math.tanh %51 : vector<8x128xf32>
    %53 = arith.mulf %49, %29 : vector<8x128xf32>
    %54 = arith.mulf %48, %52 : vector<8x128xf32>
    %55 = arith.addf %53, %54 : vector<8x128xf32>
    %56 = math.tanh %55 : vector<8x128xf32>
    %57 = arith.mulf %50, %56 : vector<8x128xf32>
    %58 = arith.index_cast %36 : i32 to index
    %c0_21 = arith.constant 0 : index
    %59 = vector.load %arg8[%58, %c0_21] : memref<32x128xf32, #tpu.memory_space<vmem>>, vector<8x128xf32>
    tpu.vector_store %arg8[%58, %c0_21], %57 {strides = array<i32>} : memref<32x128xf32, #tpu.memory_space<vmem>>, vector<8x128xf32>,
    %60 = arith.truncf %57 : vector<8x128xf32> to vector<8x128xbf16>
    %c2_i32 = arith.constant 2 : i32
    %c8_i32_22 = arith.constant 8 : i32
    %61 = arith.muli %c2_i32, %c8_i32_22 : i32
    %62 = tpu.assume_multiple %61, 8 : i32
    %63 = arith.index_cast %62 : i32 to index
    %c0_23 = arith.constant 0 : index
    %64 = vector.load %arg7[%63, %c0_23] : memref<32x512xf32, #tpu.memory_space<vmem>>, vector<8x512xf32>
    %c0_24 = arith.constant 0 : index
    %c0_25 = arith.constant 0 : index
    %65 = vector.load %arg2[%c0_24, %c0_25] : memref<128x512xbf16, #tpu.memory_space<vmem>>, vector<128x512xbf16>
    %cst_26 = arith.constant dense<0.000000e+00> : vector<8x512xf32>
    %66 = tpu.matmul %60, %65, %cst_26 {dimension_numbers = #tpu.dot_dimension_numbers<[1], [0], [0], [1], [0, 0, 1, 1], [], []>} : vector<8x128xbf16>, vector<128x512xbf16>, vector<8x512xf32> -> vector<8x512xf32>
    %67 = arith.addf %64, %66 : vector<8x512xf32>
    %68 = vector.extract_strided_slice %67 {offsets = [0, 0], sizes = [8, 384], strides = [1, 1]} : vector<8x512xf32> to vector<8x384xf32>
    %69 = arith.negf %68 : vector<8x384xf32>
    %70 = math.exp %69 : vector<8x384xf32>
    %cst_27 = arith.constant 1.000000e+00 : f32
    %71 = vector.broadcast %cst_27 : f32 to vector<8x384xf32>
    %72 = arith.addf %71, %70 : vector<8x384xf32>
    %73 = arith.divf %71, %72 : vector<8x384xf32>
    %74 = vector.extract_strided_slice %73 {offsets = [0, 0], sizes = [8, 128], strides = [1, 1]} : vector<8x384xf32> to vector<8x128xf32>
    %75 = vector.extract_strided_slice %73 {offsets = [0, 128], sizes = [8, 128], strides = [1, 1]} : vector<8x384xf32> to vector<8x128xf32>
    %76 = vector.extract_strided_slice %73 {offsets = [0, 256], sizes = [8, 128], strides = [1, 1]} : vector<8x384xf32> to vector<8x128xf32>
    %77 = vector.extract_strided_slice %67 {offsets = [0, 384], sizes = [8, 128], strides = [1, 1]} : vector<8x512xf32> to vector<8x128xf32>
    %78 = math.tanh %77 : vector<8x128xf32>
    %79 = arith.mulf %75, %55 : vector<8x128xf32>
    %80 = arith.mulf %74, %78 : vector<8x128xf32>
    %81 = arith.addf %79, %80 : vector<8x128xf32>
    %82 = math.tanh %81 : vector<8x128xf32>
    %83 = arith.mulf %76, %82 : vector<8x128xf32>
    %84 = arith.index_cast %62 : i32 to index
    %c0_28 = arith.constant 0 : index
    %85 = vector.load %arg8[%84, %c0_28] : memref<32x128xf32, #tpu.memory_space<vmem>>, vector<8x128xf32>
    tpu.vector_store %arg8[%84, %c0_28], %83 {strides = array<i32>} : memref<32x128xf32, #tpu.memory_space<vmem>>, vector<8x128xf32>,
    %86 = arith.truncf %83 : vector<8x128xf32> to vector<8x128xbf16>
    %c3_i32 = arith.constant 3 : i32
    %c8_i32_29 = arith.constant 8 : i32
    %87 = arith.muli %c3_i32, %c8_i32_29 : i32
    %88 = tpu.assume_multiple %87, 8 : i32
    %89 = arith.index_cast %88 : i32 to index
    %c0_30 = arith.constant 0 : index
    %90 = vector.load %arg7[%89, %c0_30] : memref<32x512xf32, #tpu.memory_space<vmem>>, vector<8x512xf32>
    %c0_31 = arith.constant 0 : index
    %c0_32 = arith.constant 0 : index
    %91 = vector.load %arg2[%c0_31, %c0_32] : memref<128x512xbf16, #tpu.memory_space<vmem>>, vector<128x512xbf16>
    %cst_33 = arith.constant dense<0.000000e+00> : vector<8x512xf32>
    %92 = tpu.matmul %86, %91, %cst_33 {dimension_numbers = #tpu.dot_dimension_numbers<[1], [0], [0], [1], [0, 0, 1, 1], [], []>} : vector<8x128xbf16>, vector<128x512xbf16>, vector<8x512xf32> -> vector<8x512xf32>
    %93 = arith.addf %90, %92 : vector<8x512xf32>
    %94 = vector.extract_strided_slice %93 {offsets = [0, 0], sizes = [8, 384], strides = [1, 1]} : vector<8x512xf32> to vector<8x384xf32>
    %95 = arith.negf %94 : vector<8x384xf32>
    %96 = math.exp %95 : vector<8x384xf32>
    %cst_34 = arith.constant 1.000000e+00 : f32
    %97 = vector.broadcast %cst_34 : f32 to vector<8x384xf32>
    %98 = arith.addf %97, %96 : vector<8x384xf32>
    %99 = arith.divf %97, %98 : vector<8x384xf32>
    %100 = vector.extract_strided_slice %99 {offsets = [0, 0], sizes = [8, 128], strides = [1, 1]} : vector<8x384xf32> to vector<8x128xf32>
    %101 = vector.extract_strided_slice %99 {offsets = [0, 128], sizes = [8, 128], strides = [1, 1]} : vector<8x384xf32> to vector<8x128xf32>
    %102 = vector.extract_strided_slice %99 {offsets = [0, 256], sizes = [8, 128], strides = [1, 1]} : vector<8x384xf32> to vector<8x128xf32>
    %103 = vector.extract_strided_slice %93 {offsets = [0, 384], sizes = [8, 128], strides = [1, 1]} : vector<8x512xf32> to vector<8x128xf32>
    %104 = math.tanh %103 : vector<8x128xf32>
    %105 = arith.mulf %101, %81 : vector<8x128xf32>
    %106 = arith.mulf %100, %104 : vector<8x128xf32>
    %107 = arith.addf %105, %106 : vector<8x128xf32>
    %108 = math.tanh %107 : vector<8x128xf32>
    %109 = arith.mulf %102, %108 : vector<8x128xf32>
    %110 = arith.index_cast %88 : i32 to index
    %c0_35 = arith.constant 0 : index
    %111 = vector.load %arg8[%110, %c0_35] : memref<32x128xf32, #tpu.memory_space<vmem>>, vector<8x128xf32>
    tpu.vector_store %arg8[%110, %c0_35], %109 {strides = array<i32>} : memref<32x128xf32, #tpu.memory_space<vmem>>, vector<8x128xf32>,
    %112 = arith.truncf %109 : vector<8x128xf32> to vector<8x128xbf16>
    %c4_i32 = arith.constant 4 : i32
    %c0_36 = arith.constant 0 : index
    %c0_37 = arith.constant 0 : index
    %113 = vector.load %arg8[%c0_36, %c0_37] : memref<32x128xf32, #tpu.memory_space<vmem>>, vector<32x128xf32>
    %114 = arith.truncf %113 : vector<32x128xf32> to vector<32x128xbf16>
    %c0_38 = arith.constant 0 : index
    %c0_39 = arith.constant 0 : index
    %115 = vector.load %arg4[%c0_38, %c0_39] : memref<128x128xbf16, #tpu.memory_space<vmem>>, vector<128x128xbf16>
    %cst_40 = arith.constant dense<0.000000e+00> : vector<32x128xf32>
    %116 = tpu.matmul %114, %115, %cst_40 {dimension_numbers = #tpu.dot_dimension_numbers<[1], [0], [0], [1], [0, 0, 1, 1], [], []>} : vector<32x128xbf16>, vector<128x128xbf16>, vector<32x128xf32> -> vector<32x128xf32>
    %c0_41 = arith.constant 0 : index
    %c0_42 = arith.constant 0 : index
    %117 = vector.load %arg5[%c0_41, %c0_42] : memref<1x128xf32, #tpu.memory_space<vmem>>, vector<1x128xf32>
    %118 = vector.broadcast %117 : vector<1x128xf32> to vector<32x128xf32>
    %119 = arith.addf %116, %118 : vector<32x128xf32>
    %cst_43 = arith.constant dense<0xFF800000> : vector<32xf32>
    %120 = vector.multi_reduction <maximumf>, %119, %cst_43 [1] : vector<32x128xf32> to vector<32xf32>
    %121 = vector.shape_cast %120 : vector<32xf32> to vector<32x1xf32>
    %122 = vector.broadcast %121 : vector<32x1xf32> to vector<32x128xf32>
    %123 = arith.subf %119, %122 : vector<32x128xf32>
    %124 = math.exp %123 : vector<32x128xf32>
    %cst_44 = arith.constant dense<0.000000e+00> : vector<32xf32>
    %125 = vector.multi_reduction <add>, %124, %cst_44 [1] : vector<32x128xf32> to vector<32xf32>
    %126 = vector.shape_cast %125 : vector<32xf32> to vector<32x1xf32>
    %127 = math.log %126 : vector<32x1xf32>
    %128 = vector.broadcast %127 : vector<32x1xf32> to vector<32x128xf32>
    %129 = arith.subf %123, %128 : vector<32x128xf32>
    %c0_45 = arith.constant 0 : index
    %c0_46 = arith.constant 0 : index
    %130 = vector.load %arg6[%c0_45, %c0_46] : memref<32x128xf32, #tpu.memory_space<vmem>>, vector<32x128xf32>
    tpu.vector_store %arg6[%c0_45, %c0_46], %129 {strides = array<i32>} : memref<32x128xf32, #tpu.memory_space<vmem>>, vector<32x128xf32>,
    return
  }
}

</mosaic_0001>

<bundles_post_ra>
// kernel: tpu_custom_call.1
= control target key start
LH: loop header
LB: loop body
LE: loop exit
PB: predicated region body
PF: predicated region fallthrough
CT: control target
= control target key end

     0   :  { %11 = vsyncpa [#allocation5], 0  ;;  %s2516_s0 = inlined_call_operand.vmem [shape: bf16[32,16], index: 0, kind: input, shape index: {}]   ;;  %s2517_s1 = inlined_call_operand.hbm [shape: bf16[16,512], index: 1, kind: input, shape index: {}]   ;;  %s2518_s2 = inlined_call_operand.hbm [shape: bf16[128,512], index: 2, kind: input, shape index: {}]   ;;  %s2519_s3 = inlined_call_operand.vmem [shape: f32[1,512], index: 3, kind: input, shape index: {}]   ;;  %s2520_s4 = inlined_call_operand.hbm [shape: bf16[128,128], index: 4, kind: input, shape index: {}]   ;;  %s2521_s5 = inlined_call_operand.vmem [shape: f32[1,128], index: 5, kind: input, shape index: {}]   ;;  %s2522_s6 = inlined_call_operand.hbm [shape: f32[32,128], index: 6, kind: output, shape index: {}]  }
   0x1   :  { %12 = vsyncpa [#allocation8], 0 }
   0x2   :  { %13 = vsyncpa [#allocation6], 0  ;;  %s2130_s21 = smov [#allocation7]   ;;  %s2131_s23 = smov [#allocation4]  }
   0x3   :  { %s33_s22 = sshll.u32 %s2130_s21, 4  ;;  %s21_s24 = sshll.u32 %s2131_s23, 4  ;;  %s34_s22 = int_to_ptr.vmem [resolvable:$true] %s33_s22  ;;  %s2176_s24 = int_to_ptr.vmem [resolvable:$true] %s21_s24 }
   0x4   :  { %s2036_s27 = scalar_lea.hbm %s2518_s2, 4096 }
   0x5   :  { %p2037_p0 = scmp.ne.s32.totalorder %s2518_s2, %s2036_s27  ;;  %p2040_p1 = scmp.lt.u32.totalorder %s2036_s27, %s2518_s2 }
   0x7   :  { %p2042_p2 = pnand %p2040_p1, %p2037_p0 }
   0x9   :  { %2045 = shalt.err (!%p2042_p2)
}
   0xa   :  { %s2046_s8 = scalar_lea.vmem %s34_s22, 4096  ;;  %p2051_p4 = scmp.lt.s32.totalorder %s34_s22, %s34_s22 }
   0xb   :  { %p2047_p3 = scmp.ne.s32.totalorder %s34_s22, %s2046_s8  ;;  %p2052_p5 = scmp.lt.s32.totalorder %s2046_s8, %s2046_s8 }
   0xd   :  { %p2053_p6 = por %p2052_p5, %p2051_p4 }
   0xf   :  { %p2054_p7 = pnand %p2053_p6, %p2047_p3 }
  0x11   :  { %2057 = shalt.err (!%p2054_p7)
}
  0x12   :  { %s2132_s9 = smov 256   ;;  %s2133_s10 = smov 16  }
  0x13   :  { %39 = dma.hbm_to_vmem [thread:$0]  %s2518_s2, 4096, %s34_s22, [#allocation8], %s2132_s9, %s2132_s9, %s2133_s10  }
  0x14   :  { %s2058_s15 = scalar_lea.hbm %s2517_s1, 512 }
  0x15   :  { %p2059_p8 = scmp.ne.s32.totalorder %s2517_s1, %s2058_s15  ;;  %p2062_p9 = scmp.lt.u32.totalorder %s2058_s15, %s2517_s1 }
  0x17   :  { %p2064_p10 = pnand %p2062_p9, %p2059_p8 }
  0x19   :  { %2067 = shalt.err (!%p2064_p10)
}
  0x1a   :  { %s2068_s20 = scalar_lea.vmem %s2176_s24, 512  ;;  %p2073_p12 = scmp.lt.s32.totalorder %s2176_s24, %s2176_s24 }
  0x1b   :  { %p2069_p11 = scmp.ne.s32.totalorder %s2176_s24, %s2068_s20  ;;  %p2074_p13 = scmp.lt.s32.totalorder %s2068_s20, %s2068_s20 }
  0x1d   :  { %p2075_p0 = por %p2074_p13, %p2073_p12 }
  0x1f   :  { %p2076_p1 = pnand %p2075_p0, %p2069_p11 }
  0x21   :  { %2079 = shalt.err (!%p2076_p1)
}
  0x22   :  { %27 = dma.hbm_to_vmem [thread:$0]  %s2517_s1, 512, %s2176_s24, [#allocation5], %s2132_s9, %s2132_s9, %s2133_s10  }
  0x23   :  { %s2134_s22 = smov [#allocation9]   ;;  %s2080_s27 = scalar_lea.hbm %s2520_s4, 1024 }
  0x24   :  { %s47_s23 = sshll.u32 %s2134_s22, 4  ;;  %p2081_p2 = scmp.ne.s32.totalorder %s2520_s4, %s2080_s27  ;;  %s48_s23 = int_to_ptr.vmem [resolvable:$true] %s47_s23 }
  0x25   :  { %p2084_p3 = scmp.lt.u32.totalorder %s2080_s27, %s2520_s4 }
  0x27   :  { %p2086_p4 = pnand %p2084_p3, %p2081_p2 }
  0x29   :  { %2089 = shalt.err (!%p2086_p4)
}
  0x2a   :  { %s2090_s8 = scalar_lea.vmem %s48_s23, 1024  ;;  %p2095_p6 = scmp.lt.s32.totalorder %s48_s23, %s48_s23 }
  0x2b   :  { %p2091_p5 = scmp.ne.s32.totalorder %s48_s23, %s2090_s8  ;;  %p2096_p7 = scmp.lt.s32.totalorder %s2090_s8, %s2090_s8 }
  0x2d   :  { %p2097_p8 = por %p2096_p7, %p2095_p6 }
  0x2f   :  { %p2098_p9 = pnand %p2097_p8, %p2091_p5 }
  0x31   :  { %2101 = shalt.err (!%p2098_p9)
}
  0x32   :  { %s2135_s1 = smov 64   ;;  %s2136_s24 = smov 4  }
  0x33   :  { %53 = dma.hbm_to_vmem [thread:$0]  %s2520_s4, 1024, %s48_s23, [#allocation8], %s2135_s1, %s2135_s1, %s2136_s24  }
  0x34   :  { %2124 = dma.done.wait [#allocation5], 512  }
  0x35   :  { %2125 = vsyncadd [#allocation5], 4294966784 }
  0x36   :  { %2126 = dma.done.wait [#allocation8], 5120  }
  0x37   :  { %2127 = vsyncadd [#allocation8], 4294962176  ;;  %v2523_v0 = vmov 0   ;;  %v1892_v1 = vld [vmem:[#allocation4 + $0x4] ss:$16 sps:$4 sm:$0xff]   ;;  %vm126_vm0 = vcmask 130048   ;;  %v76_v39 = vlaneseq }
  0x38   :  { %165 = vmatprep.mubr.bf16.mxu1 %v2523_v0  ;;  %486 = vmatprep.mubr.bf16.mxu0 %v2523_v0  ;;  %v2221_v2 = vld [vmem:[#allocation7 + $0x4] ss:$16 sps:$4 sm:$0xff]   ;;  %v1896_v3 = vld [vmem:[#allocation4] ss:$16 sps:$4 sm:$0xff]   ;;  %v1899_v6 = vld [vmem:[#allocation4 + $0x8] ss:$16 sps:$4 sm:$0xff]  }
  0x39   :  { %133 = vmatprep.subr.bf16.mxu1 %v1892_v1  ;;  %v2223_v4 = vld [vmem:[#allocation7] ss:$16 sps:$4 sm:$0xff]   ;;  %454 = vmatprep.subr.bf16.mxu0 %v2221_v2  ;;  %v1901_v7 = vld [vmem:[#allocation4 + $0xc] ss:$16 sps:$4 sm:$0xff]   ;;  %v2230_v8 = vld [vmem:[#allocation7 + $0x24] ss:$16 sps:$4 sm:$0xff]  }
  0x3a   :  { %v1898_v5 = vld [vmem:[%s2516_s0] sm:$0xff]   ;;  %134 = vmatpush1.bf16.msra.mxu1 %v1896_v3  ;;  %455 = vmatpush1.bf16.msra.mxu0 %v2223_v4  ;;  %v1908_v13 = vld [vmem:[%s2516_s0 + $0x8] sm:$0xff]   ;;  %v77_v40 = vshrl.u32 %v76_v39, 7 }
  0x3b   :  { %186 = vmatprep.subr.bf16.mxu1 %v1901_v7  ;;  %v2232_v9 = vld [vmem:[#allocation7 + $0x20] ss:$16 sps:$4 sm:$0xff]   ;;  %456 = vmatprep.subr.bf16.mxu0 %v2230_v8  ;;  %v2236_v10 = vld [vmem:[#allocation7 + $0x44] ss:$16 sps:$4 sm:$0xff]   ;;  %v2251_v15 = vld [vmem:[#allocation7 + $0xc] ss:$16 sps:$4 sm:$0xff]  }
  0x3c   :  { %v2239_v11 = vld [vmem:[#allocation7 + $0x40] ss:$16 sps:$4 sm:$0xff]   ;;  %v2243_v12 = vld [vmem:[#allocation7 + $0x64] ss:$16 sps:$4 sm:$0xff]   ;;  %v2266_v19 = vld [vmem:[#allocation7 + $0x8] ss:$16 sps:$4 sm:$0xff]  }
  0x3d   :  { %1698 = vmatmul.mubr.msk.bf16.vlgmr.msra.gmra.mrb[0].mxu1 %vm126_vm0, %v1898_v5  ;;  %v2249_v14 = vld [vmem:[#allocation7 + $0x60] ss:$16 sps:$4 sm:$0xff]   ;;  %v2254_v16 = vld [vmem:[#allocation7 + $0x84] ss:$16 sps:$4 sm:$0xff]   ;;  %v2271_v21 = vld [vmem:[#allocation7 + $0x2c] ss:$16 sps:$4 sm:$0xff]  }
  0x3e   :  { %187 = vmatpush1.bf16.msra.mxu1 %v1899_v6  ;;  %457 = vmatpush1.bf16.msra.mxu0 %v2232_v9  ;;  %v2259_v17 = vld [vmem:[#allocation7 + $0x80] ss:$16 sps:$4 sm:$0xff]   ;;  %v2263_v18 = vld [vmem:[#allocation7 + $0xa4] ss:$16 sps:$4 sm:$0xff]   ;;  %v2278_v23 = vld [vmem:[#allocation7 + $0x28] ss:$16 sps:$4 sm:$0xff]  }
  0x3f   :  { %458 = vmatprep.subr.bf16.mxu0 %v2236_v10  ;;  %175 = vmatprep.mubr.bf16.mxu1 %v2523_v0  ;;  %v2268_v20 = vld [vmem:[#allocation7 + $0xa0] ss:$16 sps:$4 sm:$0xff]   ;;  %v2273_v22 = vld [vmem:[#allocation7 + $0xc4] ss:$16 sps:$4 sm:$0xff]   ;;  %v2284_v25 = vld [vmem:[#allocation7 + $0x4c] ss:$16 sps:$4 sm:$0xff]  }
  0x40   :  { %495 = vmatprep.subr.bf16.mxu1 %v2251_v15  ;;  %v2280_v24 = vld [vmem:[#allocation7 + $0xc0] ss:$16 sps:$4 sm:$0xff]   ;;  %v2286_v26 = vld [vmem:[#allocation7 + $0xe4] ss:$16 sps:$4 sm:$0xff]   ;;  %v2288_v27 = vld [vmem:[#allocation7 + $0x48] ss:$16 sps:$4 sm:$0xff]  }
  0x41   :  { %v2290_v28 = vld [vmem:[#allocation7 + $0xe0] ss:$16 sps:$4 sm:$0xff]   ;;  %v2293_v29 = vld [vmem:[#allocation7 + $0x6c] ss:$16 sps:$4 sm:$0xff]   ;;  %v2302_v30 = vld [vmem:[#allocation7 + $0x68] ss:$16 sps:$4 sm:$0xff]  }
  0x42   :  { %459 = vmatpush1.bf16.msra.mxu0 %v2239_v11  ;;  %v2305_v31 = vld [vmem:[#allocation7 + $0x8c] ss:$16 sps:$4 sm:$0xff]   ;;  %v2311_v32 = vld [vmem:[#allocation7 + $0x88] ss:$16 sps:$4 sm:$0xff]   ;;  %v78_v41 = vsub.s32 0, %v77_v40  ;;  %v82_v43 = vsub.s32 1, %v77_v40 }
  0x43   :  { %460 = vmatprep.subr.bf16.mxu0 %v2243_v12  ;;  %v2315_v33 = vld [vmem:[#allocation7 + $0xac] ss:$16 sps:$4 sm:$0xff]   ;;  %v2320_v34 = vld [vmem:[#allocation7 + $0xa8] ss:$16 sps:$4 sm:$0xff]   ;;  %v74_v42 = vld [vmem:[%s2519_s3] sm:$0xf] }
  0x44   :  { %v2324_v35 = vld [vmem:[#allocation7 + $0xcc] ss:$16 sps:$4 sm:$0xff]   ;;  %v2328_v36 = vld [vmem:[#allocation7 + $0xc8] ss:$16 sps:$4 sm:$0xff]   ;;  %v79_v45 = vrot.slane %v74_v42, %v78_v41  ;;  %v83_v47 = vrot.slane %v74_v42, %v82_v43  ;;  %v86_v60 = vsub.s32 2, %v77_v40  ;;  %v90_v61 = vsub.s32 3, %v77_v40 }
  0x45   :  { %1699 = vmatmul.mubr.msk.bf16.gmra.mrb[4].mxu1 %vm126_vm0, %v1908_v13  ;;  %v2332_v37 = vld [vmem:[#allocation7 + $0xec] ss:$16 sps:$4 sm:$0xff]   ;;  %v2336_v38 = vld [vmem:[#allocation7 + $0xe8] ss:$16 sps:$4 sm:$0xff]  }
  0x46   :  { %461 = vmatpush1.bf16.msra.mxu0 %v2249_v14  ;;  %218 = vmatprep.mubr.bf16.mxu1 %v2523_v0  ;;  %v87_v63 = vrot.slane %v74_v42, %v86_v60  ;;  %v91_v3 = vrot.slane %v74_v42, %v90_v61 }
  0x47   :  { %462 = vmatprep.subr.bf16.mxu0 %v2254_v16 }
  0x4a   :  { %463 = vmatpush1.bf16.msra.mxu0 %v2259_v17 }
  0x4b   :  { %464 = vmatprep.subr.bf16.mxu0 %v2263_v18 }
  0x4d   :  { %1700 = vmatmul.mubr.msk.bf16.vlgmr.msra.gmra.mrb[8].mxu1 %vm126_vm0, %v1898_v5 }
  0x4e   :  { %496 = vmatpush1.bf16.msra.mxu1 %v2266_v19  ;;  %465 = vmatpush1.bf16.msra.mxu0 %v2268_v20 }
  0x4f   :  { %497 = vmatprep.subr.bf16.mxu1 %v2271_v21  ;;  %466 = vmatprep.subr.bf16.mxu0 %v2273_v22 }
  0x50   :  { %228 = vmatprep.mubr.bf16.mxu1 %v2523_v0 }
  0x52   :  { %498 = vmatpush1.bf16.msra.mxu1 %v2278_v23  ;;  %467 = vmatpush1.bf16.msra.mxu0 %v2280_v24 }
  0x53   :  { %499 = vmatprep.subr.bf16.mxu1 %v2284_v25  ;;  %468 = vmatprep.subr.bf16.mxu0 %v2286_v26 }
  0x55   :  { %1701 = vmatmul.mubr.msk.bf16.gmra.mrb[12].mxu1 %vm126_vm0, %v1908_v13 }
  0x56   :  { %500 = vmatpush1.bf16.msra.mxu1 %v2288_v27  ;;  %469 = vmatpush1.bf16.msra.mxu0 %v2290_v28 }
  0x57   :  { %501 = vmatprep.subr.bf16.mxu1 %v2293_v29  ;;  %527 = vmatprep.mubr.bf16.mxu1 %v2523_v0 }
  0x58   :  { %765 = vmatprep.subr.bf16.mxu0 %v2221_v2 }
  0x59   :  { %487 = vmatmul.mubr.bf16.vlgmr.msra.gmra.mrb[0].mxu0 %v2523_v0 }
  0x5a   :  { %502 = vmatpush1.bf16.msra.mxu1 %v2302_v30  ;;  %766 = vmatpush1.bf16.msra.mxu0 %v2223_v4 }
  0x5b   :  { %503 = vmatprep.subr.bf16.mxu1 %v2305_v31  ;;  %767 = vmatprep.subr.bf16.mxu0 %v2230_v8 }
  0x5c   :  { %797 = vmatprep.mubr.bf16.mxu0 %v2523_v0 }
  0x5e   :  { %504 = vmatpush1.bf16.msra.mxu1 %v2311_v32  ;;  %768 = vmatpush1.bf16.msra.mxu0 %v2232_v9 }
  0x5f   :  { %505 = vmatprep.subr.bf16.mxu1 %v2315_v33  ;;  %769 = vmatprep.subr.bf16.mxu0 %v2236_v10 }
  0x62   :  { %506 = vmatpush1.bf16.msra.mxu1 %v2320_v34  ;;  %770 = vmatpush1.bf16.msra.mxu0 %v2239_v11 }
  0x63   :  { %507 = vmatprep.subr.bf16.mxu1 %v2324_v35  ;;  %771 = vmatprep.subr.bf16.mxu0 %v2243_v12 }
  0x66   :  { %508 = vmatpush1.bf16.msra.mxu1 %v2328_v36  ;;  %772 = vmatpush1.bf16.msra.mxu0 %v2249_v14 }
  0x67   :  { %509 = vmatprep.subr.bf16.mxu1 %v2332_v37  ;;  %773 = vmatprep.subr.bf16.mxu0 %v2254_v16 }
  0x6a   :  { %510 = vmatpush1.bf16.msra.mxu1 %v2336_v38  ;;  %774 = vmatpush1.bf16.msra.mxu0 %v2259_v17 }
  0x6b   :  { %806 = vmatprep.subr.bf16.mxu1 %v2251_v15  ;;  %775 = vmatprep.subr.bf16.mxu0 %v2263_v18 }
  0x6d   :  { %528 = vmatmul.mubr.bf16.vlgmr.msra.gmra.mrb[16].mxu1 %v2523_v0 }
  0x6e   :  { %807 = vmatpush1.bf16.msra.mxu1 %v2266_v19  ;;  %776 = vmatpush1.bf16.msra.mxu0 %v2268_v20 }
  0x6f   :  { %808 = vmatprep.subr.bf16.mxu1 %v2271_v21  ;;  %777 = vmatprep.subr.bf16.mxu0 %v2273_v22 }
  0x70   :  { %838 = vmatprep.mubr.bf16.mxu1 %v2523_v0 }
  0x72   :  { %809 = vmatpush1.bf16.msra.mxu1 %v2278_v23  ;;  %778 = vmatpush1.bf16.msra.mxu0 %v2280_v24 }
  0x73   :  { %810 = vmatprep.subr.bf16.mxu1 %v2284_v25  ;;  %779 = vmatprep.subr.bf16.mxu0 %v2286_v26 }
  0x76   :  { %811 = vmatpush1.bf16.msra.mxu1 %v2288_v27  ;;  %780 = vmatpush1.bf16.msra.mxu0 %v2290_v28 }
  0x77   :  { %812 = vmatprep.subr.bf16.mxu1 %v2293_v29  ;;  %1077 = vmatprep.subr.bf16.mxu0 %v2221_v2 }
  0x7a   :  { %813 = vmatpush1.bf16.msra.mxu1 %v2302_v30 }
  0x7b   :  { %814 = vmatprep.subr.bf16.mxu1 %v2305_v31 }
  0x7e   :  { %815 = vmatpush1.bf16.msra.mxu1 %v2311_v32 }
  0x7f   :  { %816 = vmatprep.subr.bf16.mxu1 %v2315_v33 }
  0x82   :  { %817 = vmatpush1.bf16.msra.mxu1 %v2320_v34 }
  0x83   :  { %818 = vmatprep.subr.bf16.mxu1 %v2324_v35 }
  0x86   :  { %819 = vmatpush1.bf16.msra.mxu1 %v2328_v36 }
  0x87   :  { %820 = vmatprep.subr.bf16.mxu1 %v2332_v37 }
  0x8a   :  { %821 = vmatpush1.bf16.msra.mxu1 %v2336_v38 }
  0x8b   :  { %1118 = vmatprep.subr.bf16.mxu1 %v2251_v15 }
 0x110   :  { %v167_v44 = vpop.f32.mrb[0].mxu1 }
 0x111   :  { %v169_v46 = vpop.f32.mrb[1].mxu1 }
 0x112   :  { %v171_v48 = vpop.f32.mrb[2].mxu1 }
 0x113   :  { %v2372_v49 = vadd.f32 %v171_v48, %v79_v45  ;;  %v173_v50 = vpop.f32.mrb[3].mxu1 }
 0x114   :  { %v2374_v51 = vadd.f32 %v173_v50, %v83_v47 }
 0x118   :  { %v177_v52 = vpop.f32.mrb[4].mxu1 }
 0x119   :  { %v2376_v53 = vadd.f32 %v177_v52, %v79_v45  ;;  %v179_v54 = vpop.f32.mrb[5].mxu1  ;;  %v168_v52 = vadd.f32 %v167_v44, %v79_v45 }
 0x11a   :  { %v2378_v55 = vadd.f32 %v179_v54, %v83_v47  ;;  %v181_v56 = vpop.f32.mrb[6].mxu1 }
 0x11b   :  { %v2380_v57 = vadd.f32 %v181_v56, %v79_v45  ;;  %v183_v58 = vpop.f32.mrb[7].mxu1  ;;  %v170_v56 = vadd.f32 %v169_v46, %v83_v47 }
 0x11c   :  { %v2382_v59 = vadd.f32 %v183_v58, %v83_v47 }
 0x11d   :  { %2525 = vst [vmem:[#allocation14_spill] sm:$0xff] %v2380_v57 }
 0x11e   :  { %2526 = vst [vmem:[#allocation15_spill] sm:$0xff] %v2382_v59 }
 0x120   :  { %v220_v62 = vpop.f32.mrb[8].mxu1 }
 0x121   :  { %v222_v1 = vpop.f32.mrb[9].mxu1  ;;  %v221_v44 = vadd.f32 %v220_v62, %v87_v63 }
 0x122   :  { %v224_v5 = vpop.f32.mrb[10].mxu1 }
 0x123   :  { %v2384_v6 = vadd.f32 %v224_v5, %v87_v63  ;;  %v226_v7 = vpop.f32.mrb[11].mxu1 }
 0x124   :  { %v2386_v13 = vadd.f32 %v226_v7, %v91_v3 }
 0x128   :  { %v230_v39 = vpop.f32.mrb[12].mxu1 }
 0x129   :  { %v2388_v41 = vadd.f32 %v230_v39, %v87_v63  ;;  %v232_v43 = vpop.f32.mrb[13].mxu1 }
 0x12a   :  { %v2390_v48 = vadd.f32 %v232_v43, %v91_v3  ;;  %v234_v50 = vpop.f32.mrb[14].mxu1 }
 0x12b   :  { %v2392_v54 = vadd.f32 %v234_v50, %v87_v63  ;;  %v236_v40 = vpop.f32.mrb[15].mxu1  ;;  %v223_v50 = vadd.f32 %v222_v1, %v91_v3 }
 0x12c   :  { %2527 = vst [vmem:[#allocation16_spill] sm:$0xff] %v2390_v48  ;;  %v488_v58 = vpop.f32.mrb[0].mxu0  ;;  %v2394_v42 = vadd.f32 %v236_v40, %v91_v3 }
 0x12d   :  { %2528 = vst [vmem:[#allocation17_spill] sm:$0xff] %v2392_v54  ;;  %v536_v60 = vadd.f32 %v488_v58, %v168_v52  ;;  %v490_v61 = vpop.f32.mrb[1].mxu0 }
 0x12e   :  { %v537_v5 = vadd.f32 %v490_v61, %v170_v56  ;;  %v492_v7 = vpop.f32.mrb[2].mxu0 }
 0x12f   :  { %v1734_v0 = vmul.f32 -1.442695, %v536_v60  ;;  %v493_v59 = vpop.f32.mrb[3].mxu0  ;;  %v2529_v7 = vmov 0  }
 0x130   :  { %v1735_v39 = vmul.f32 -1.442695, %v537_v5 }
 0x131   :  { %1956 = vpow2.f32 %v1734_v0 }
 0x132   :  { %1958 = vpow2.f32 %v1735_v39 }
 0x13b   :  { %v1957_v43 = vpop.eup %1956 }
 0x13c   :  { %v1959_v57 = vpop.eup %1958  ;;  %v549_v45 = vadd.f32 1.0, %v1957_v43 }
 0x13d   :  { %v550_v48 = vadd.f32 1.0, %v1959_v57 }
 0x13f   :  { %1960 = vrcp.f32 %v550_v48 }
 0x140   :  { %v529_v54 = vpop.f32.mrb[16].mxu1  ;;  %1962 = vrcp.f32 %v549_v45 }
 0x141   :  { %v538_v46 = vadd.f32 %v529_v54, %v221_v44  ;;  %v531_v47 = vpop.f32.mrb[17].mxu1 }
 0x142   :  { %v539_v40 = vadd.f32 %v531_v47, %v223_v50  ;;  %v533_v52 = vpop.f32.mrb[18].mxu1 }
 0x143   :  { %v1736_v56 = vmul.f32 -1.442695, %v538_v46  ;;  %v534_v58 = vpop.f32.mrb[19].mxu1 }
 0x144   :  { %1964 = vtanh.f32 %v539_v40 }
 0x145   :  { %1966 = vpow2.f32 %v1736_v56 }
 0x149   :  { %v1961_v59 = vpop.eup %1960 }
 0x14a   :  { %v1963_v0 = vpop.eup %1962  ;;  %v559_v5 = vmul.f32 0.0, %v1961_v59 }
 0x14e   :  { %v1965_v60 = vpop.eup %1964 }
 0x14f   :  { %v1967_v61 = vpop.eup %1966  ;;  %v560_v57 = vmul.f32 %v1965_v60, %v1963_v0 }
 0x150   :  { %v551_v62 = vadd.f32 1.0, %v1967_v61 }
 0x151   :  { %v2396_v63 = vadd.f32 %v560_v57, %v559_v5 }
 0x152   :  { %1968 = vrcp.f32 %v551_v62 }
 0x153   :  { %1970 = vtanh.f32 %v2396_v63 }
 0x15c   :  { %v1969_v1 = vpop.eup %1968 }
 0x15d   :  { %v1971_v3 = vpop.eup %1970 }
 0x15e   :  { %v2399_v48 = vmul.f32 %v1971_v3, %v1969_v1 }
 0x160   :  { %v565_v54 = vpack.c.bf16 %v2399_v48, %v2399_v48 }
 0x162   :  { %798 = vmatmul.mubr.bf16.vlgmr.msra.gmra.mrb[4].mxu0 %v565_v54  ;;  %839 = vmatmul.mubr.bf16.vlgmr.msra.gmra.mrb[20].mxu1 %v565_v54 }
 0x163   :  { %1078 = vmatpush1.bf16.msra.mxu0 %v2223_v4  ;;  %1119 = vmatpush1.bf16.msra.mxu1 %v2266_v19 }
 0x164   :  { %1079 = vmatprep.subr.bf16.mxu0 %v2230_v8  ;;  %1120 = vmatprep.subr.bf16.mxu1 %v2271_v21 }
 0x165   :  { %1109 = vmatprep.mubr.bf16.mxu0 %v2529_v7  ;;  %1150 = vmatprep.mubr.bf16.mxu1 %v2529_v7 }
 0x167   :  { %1080 = vmatpush1.bf16.msra.mxu0 %v2232_v9  ;;  %1121 = vmatpush1.bf16.msra.mxu1 %v2278_v23 }
 0x168   :  { %1081 = vmatprep.subr.bf16.mxu0 %v2236_v10  ;;  %1122 = vmatprep.subr.bf16.mxu1 %v2284_v25 }
 0x16b   :  { %1082 = vmatpush1.bf16.msra.mxu0 %v2239_v11  ;;  %1123 = vmatpush1.bf16.msra.mxu1 %v2288_v27 }
 0x16c   :  { %1083 = vmatprep.subr.bf16.mxu0 %v2243_v12  ;;  %1124 = vmatprep.subr.bf16.mxu1 %v2293_v29 }
 0x16f   :  { %1084 = vmatpush1.bf16.msra.mxu0 %v2249_v14  ;;  %1125 = vmatpush1.bf16.msra.mxu1 %v2302_v30 }
 0x170   :  { %1085 = vmatprep.subr.bf16.mxu0 %v2254_v16  ;;  %1126 = vmatprep.subr.bf16.mxu1 %v2305_v31 }
 0x173   :  { %1086 = vmatpush1.bf16.msra.mxu0 %v2259_v17  ;;  %1127 = vmatpush1.bf16.msra.mxu1 %v2311_v32 }
 0x174   :  { %1087 = vmatprep.subr.bf16.mxu0 %v2263_v18  ;;  %1128 = vmatprep.subr.bf16.mxu1 %v2315_v33 }
 0x177   :  { %1088 = vmatpush1.bf16.msra.mxu0 %v2268_v20  ;;  %1129 = vmatpush1.bf16.msra.mxu1 %v2320_v34 }
 0x178   :  { %1089 = vmatprep.subr.bf16.mxu0 %v2273_v22  ;;  %1130 = vmatprep.subr.bf16.mxu1 %v2324_v35 }
 0x17b   :  { %1090 = vmatpush1.bf16.msra.mxu0 %v2280_v24  ;;  %1131 = vmatpush1.bf16.msra.mxu1 %v2328_v36 }
 0x17c   :  { %1091 = vmatprep.subr.bf16.mxu0 %v2286_v26  ;;  %1132 = vmatprep.subr.bf16.mxu1 %v2332_v37 }
 0x17f   :  { %1092 = vmatpush1.bf16.msra.mxu0 %v2290_v28  ;;  %1133 = vmatpush1.bf16.msra.mxu1 %v2336_v38 }
 0x180   :  { %1389 = vmatprep.subr.bf16.mxu0 %v2221_v2  ;;  %1430 = vmatprep.subr.bf16.mxu1 %v2251_v15 }
 0x235   :  { %v799_v39 = vpop.f32.mrb[4].mxu0  ;;  %v840_v43 = vpop.f32.mrb[20].mxu1 }
 0x236   :  { %v847_v44 = vadd.f32 %v799_v39, %v2372_v49  ;;  %v849_v45 = vadd.f32 %v840_v43, %v2384_v6  ;;  %v801_v50 = vpop.f32.mrb[5].mxu0  ;;  %v842_v46 = vpop.f32.mrb[21].mxu1 }
 0x237   :  { %v848_v47 = vadd.f32 %v801_v50, %v2374_v51  ;;  %v850_v40 = vadd.f32 %v842_v46, %v2386_v13  ;;  %v803_v52 = vpop.f32.mrb[6].mxu0  ;;  %v844_v56 = vpop.f32.mrb[22].mxu1  ;;  %v1950_v50 = vld [vmem:[#allocation9 + $0x10] sm:$0xff]   ;;  %v1951_v46 = vld [vmem:[#allocation9 + $0x18] sm:$0xff]  }
 0x238   :  { %v1769_v58 = vmul.f32 -1.442695, %v847_v44  ;;  %v804_v59 = vpop.f32.mrb[7].mxu0  ;;  %v845_v0 = vpop.f32.mrb[23].mxu1  ;;  %v1771_v15 = vmul.f32 -1.442695, %v849_v45 }
 0x239   :  { %v1770_v2 = vmul.f32 -1.442695, %v848_v47  ;;  %v1952_v47 = vld [vmem:[#allocation9 + $0x20] sm:$0xff]   ;;  %v1955_v52 = vld [vmem:[#allocation9 + $0x38] sm:$0xff]  }
 0x23a   :  { %1972 = vpow2.f32 %v1769_v58  ;;  %v2531_v59 = vld [vmem:[#allocation14_spill] sm:$0xff] }
 0x23b   :  { %1974 = vpow2.f32 %v1770_v2  ;;  %v2532_v2 = vld [vmem:[#allocation17_spill] sm:$0xff] }
 0x23c   :  { %1976 = vtanh.f32 %v850_v40  ;;  %v1953_v40 = vld [vmem:[#allocation9 + $0x28] sm:$0xff]  }
 0x23d   :  { %1978 = vpow2.f32 %v1771_v15 }
 0x244   :  { %v1973_v60 = vpop.eup %1972 }
 0x245   :  { %v860_v61 = vadd.f32 1.0, %v1973_v60  ;;  %v1975_v49 = vpop.eup %1974 }
 0x246   :  { %v861_v6 = vadd.f32 1.0, %v1975_v49  ;;  %v1977_v51 = vpop.eup %1976  ;;  %v2533_v49 = vld [vmem:[#allocation15_spill] sm:$0xff] }
 0x247   :  { %1980 = vrcp.f32 %v860_v61  ;;  %v1979_v5 = vpop.eup %1978 }
 0x248   :  { %1982 = vrcp.f32 %v861_v6  ;;  %v862_v1 = vadd.f32 1.0, %v1979_v5 }
 0x24a   :  { %1984 = vrcp.f32 %v862_v1 }
 0x251   :  { %v1981_v13 = vpop.eup %1980 }
 0x252   :  { %v871_v57 = vmul.f32 %v1981_v13, %v1977_v51  ;;  %v1983_v62 = vpop.eup %1982 }
 0x253   :  { %v870_v3 = vmul.f32 %v1983_v62, %v2396_v63  ;;  %v1948_v63 = vld [vmem:[#allocation9] sm:$0xff]  }
 0x254   :  { %v1985_v39 = vpop.eup %1984 }
 0x255   :  { %v2442_v54 = vadd.f32 %v871_v57, %v870_v3 }
 0x257   :  { %1986 = vtanh.f32 %v2442_v54 }
 0x261   :  { %v1987_v43 = vpop.eup %1986 }
 0x262   :  { %v2445_v44 = vmul.f32 %v1987_v43, %v1985_v39 }
 0x264   :  { %v877_v45 = vpack.c.bf16 %v2445_v44, %v2445_v44 }
 0x266   :  { %1110 = vmatmul.mubr.bf16.vlgmr.msra.gmra.mrb[8].mxu0 %v877_v45  ;;  %1151 = vmatmul.mubr.bf16.vlgmr.msra.gmra.mrb[24].mxu1 %v877_v45 }
 0x267   :  { %1390 = vmatpush1.bf16.msra.mxu0 %v2223_v4  ;;  %1431 = vmatpush1.bf16.msra.mxu1 %v2266_v19 }
 0x268   :  { %1391 = vmatprep.subr.bf16.mxu0 %v2230_v8  ;;  %1432 = vmatprep.subr.bf16.mxu1 %v2271_v21 }
 0x269   :  { %1421 = vmatprep.mubr.bf16.mxu0 %v2529_v7  ;;  %1462 = vmatprep.mubr.bf16.mxu1 %v2529_v7  ;;  %v1949_v7 = vld [vmem:[#allocation9 + $0x8] sm:$0xff]  }
 0x26b   :  { %1392 = vmatpush1.bf16.msra.mxu0 %v2232_v9  ;;  %1433 = vmatpush1.bf16.msra.mxu1 %v2278_v23 }
 0x26c   :  { %1393 = vmatprep.subr.bf16.mxu0 %v2236_v10  ;;  %1434 = vmatprep.subr.bf16.mxu1 %v2284_v25 }
 0x26f   :  { %1394 = vmatpush1.bf16.msra.mxu0 %v2239_v11  ;;  %1435 = vmatpush1.bf16.msra.mxu1 %v2288_v27 }
 0x270   :  { %1395 = vmatprep.subr.bf16.mxu0 %v2243_v12  ;;  %1436 = vmatprep.subr.bf16.mxu1 %v2293_v29 }
 0x273   :  { %1396 = vmatpush1.bf16.msra.mxu0 %v2249_v14  ;;  %1437 = vmatpush1.bf16.msra.mxu1 %v2302_v30 }
 0x274   :  { %1397 = vmatprep.subr.bf16.mxu0 %v2254_v16  ;;  %1438 = vmatprep.subr.bf16.mxu1 %v2305_v31  ;;  %v2530_v16 = vld [vmem:[#allocation16_spill] sm:$0xff] }
 0x277   :  { %1398 = vmatpush1.bf16.msra.mxu0 %v2259_v17  ;;  %1439 = vmatpush1.bf16.msra.mxu1 %v2311_v32 }
 0x278   :  { %1399 = vmatprep.subr.bf16.mxu0 %v2263_v18  ;;  %1440 = vmatprep.subr.bf16.mxu1 %v2315_v33 }
 0x27b   :  { %1400 = vmatpush1.bf16.msra.mxu0 %v2268_v20  ;;  %1441 = vmatpush1.bf16.msra.mxu1 %v2320_v34 }
 0x27c   :  { %1401 = vmatprep.subr.bf16.mxu0 %v2273_v22  ;;  %1442 = vmatprep.subr.bf16.mxu1 %v2324_v35 }
 0x27f   :  { %1402 = vmatpush1.bf16.msra.mxu0 %v2280_v24  ;;  %1443 = vmatpush1.bf16.msra.mxu1 %v2328_v36 }
 0x280   :  { %1403 = vmatprep.subr.bf16.mxu0 %v2286_v26  ;;  %1444 = vmatprep.subr.bf16.mxu1 %v2332_v37 }
 0x283   :  { %1404 = vmatpush1.bf16.msra.mxu0 %v2290_v28  ;;  %1445 = vmatpush1.bf16.msra.mxu1 %v2336_v38 }
 0x284   :  { %1861 = vmatprep.subr.bf16.mxu0 %v1948_v63 }
 0x339   :  { %v1111_v4 = vpop.f32.mrb[8].mxu0  ;;  %v1152_v8 = vpop.f32.mrb[24].mxu1 }
 0x33a   :  { %v1159_v9 = vadd.f32 %v1111_v4, %v2376_v53  ;;  %v1161_v10 = vadd.f32 %v1152_v8, %v2388_v41  ;;  %v1113_v11 = vpop.f32.mrb[9].mxu0  ;;  %v1154_v12 = vpop.f32.mrb[25].mxu1  ;;  %v1505_v41 = vpack.c.bf16 %v2445_v44, %v2399_v48  ;;  %v1954_v48 = vld [vmem:[#allocation9 + $0x30] sm:$0xff]  }
 0x33b   :  { %v1160_v14 = vadd.f32 %v1113_v11, %v2378_v55  ;;  %v1162_v17 = vadd.f32 %v1154_v12, %v2530_v16  ;;  %v1115_v18 = vpop.f32.mrb[10].mxu0  ;;  %v1156_v19 = vpop.f32.mrb[26].mxu1 }
 0x33c   :  { %v1804_v20 = vmul.f32 -1.442695, %v1159_v9  ;;  %v1116_v21 = vpop.f32.mrb[11].mxu0  ;;  %v1157_v22 = vpop.f32.mrb[27].mxu1  ;;  %v1806_v24 = vmul.f32 -1.442695, %v1161_v10 }
 0x33d   :  { %v1805_v23 = vmul.f32 -1.442695, %v1160_v14 }
 0x33e   :  { %1988 = vpow2.f32 %v1804_v20  ;;  %v1842_v20 = vld [vmem:[%s2521_s5] ss:$0 sm:$0xff]  ;;  %s2138_s5 = smov [#allocation10]  }
 0x33f   :  { %1990 = vpow2.f32 %v1805_v23  ;;  %s1676_s16 = sshll.u32 %s2138_s5, 4  ;;  %s1677_s16 = int_to_ptr.vmem [resolvable:$true] %s1676_s16 }
 0x340   :  { %1992 = vtanh.f32 %v1162_v17  ;;  %s2102_s17 = scalar_lea.vmem %s1677_s16, 512  ;;  %p2107_p11 = scmp.lt.s32.totalorder %s1677_s16, %s1677_s16 }
 0x341   :  { %1994 = vpow2.f32 %v1806_v24  ;;  %p2103_p10 = scmp.ne.s32.totalorder %s1677_s16, %s2102_s17  ;;  %p2108_p12 = scmp.lt.s32.totalorder %s2102_s17, %s2102_s17 }
 0x343   :  { %p2109_p13 = por %p2108_p12, %p2107_p11 }
 0x345   :  { %p2110_p0 = pnand %p2109_p13, %p2103_p10 }
 0x348   :  { %v1989_v25 = vpop.eup %1988 }
 0x349   :  { %v1172_v26 = vadd.f32 1.0, %v1989_v25  ;;  %v1991_v27 = vpop.eup %1990 }
 0x34a   :  { %v1173_v28 = vadd.f32 1.0, %v1991_v27  ;;  %v1993_v29 = vpop.eup %1992 }
 0x34b   :  { %1996 = vrcp.f32 %v1172_v26  ;;  %v1995_v30 = vpop.eup %1994 }
 0x34c   :  { %1998 = vrcp.f32 %v1173_v28  ;;  %v1174_v34 = vadd.f32 1.0, %v1995_v30 }
 0x34e   :  { %2000 = vrcp.f32 %v1174_v34 }
 0x355   :  { %v1997_v31 = vpop.eup %1996 }
 0x356   :  { %v1183_v32 = vmul.f32 %v1997_v31, %v1993_v29  ;;  %v1999_v33 = vpop.eup %1998 }
 0x357   :  { %v1182_v35 = vmul.f32 %v1999_v33, %v2442_v54 }
 0x358   :  { %v2001_v37 = vpop.eup %2000 }
 0x359   :  { %v2486_v36 = vadd.f32 %v1183_v32, %v1182_v35 }
 0x35b   :  { %2002 = vtanh.f32 %v2486_v36 }
 0x365   :  { %v2003_v38 = vpop.eup %2002 }
 0x366   :  { %v2489_v53 = vmul.f32 %v2003_v38, %v2001_v37 }
 0x368   :  { %v1189_v55 = vpack.c.bf16 %v2489_v53, %v2489_v53 }
 0x36a   :  { %1422 = vmatmul.mubr.bf16.vlgmr.msra.gmra.mrb[12].mxu0 %v1189_v55  ;;  %1463 = vmatmul.mubr.bf16.vlgmr.msra.gmra.mrb[28].mxu1 %v1189_v55 }
 0x36b   :  { %1877 = vmatprep.mubr.bf16.mxu0 %v1505_v41  ;;  %1862 = vmatpush3.bf16.msra.mxu0 %v1948_v63 }
 0x36c   :  { %1863 = vmatprep.subr.bf16.mxu0 %v1949_v7 }
 0x36f   :  { %1864 = vmatpush3.bf16.msra.mxu0 %v1949_v7 }
 0x370   :  { %1865 = vmatprep.subr.bf16.mxu0 %v1950_v50 }
 0x373   :  { %1866 = vmatpush3.bf16.msra.mxu0 %v1950_v50 }
 0x374   :  { %1867 = vmatprep.subr.bf16.mxu0 %v1951_v46 }
 0x377   :  { %1868 = vmatpush3.bf16.msra.mxu0 %v1951_v46 }
 0x378   :  { %1869 = vmatprep.subr.bf16.mxu0 %v1952_v47 }
 0x37b   :  { %1870 = vmatpush3.bf16.msra.mxu0 %v1952_v47 }
 0x37c   :  { %1871 = vmatprep.subr.bf16.mxu0 %v1953_v40 }
 0x37f   :  { %1872 = vmatpush3.bf16.msra.mxu0 %v1953_v40 }
 0x380   :  { %1873 = vmatprep.subr.bf16.mxu0 %v1954_v48 }
 0x383   :  { %1874 = vmatpush3.bf16.msra.mxu0 %v1954_v48 }
 0x384   :  { %1875 = vmatprep.subr.bf16.mxu0 %v1955_v52 }
 0x387   :  { %1876 = vmatpush3.bf16.msra.mxu0 %v1955_v52 }
 0x43d   :  { %v1423_v56 = vpop.f32.mrb[12].mxu0  ;;  %v1464_v58 = vpop.f32.mrb[28].mxu1 }
 0x43e   :  { %v1471_v0 = vadd.f32 %v1423_v56, %v2531_v59  ;;  %v1473_v15 = vadd.f32 %v1464_v58, %v2532_v2  ;;  %v1425_v60 = vpop.f32.mrb[13].mxu0  ;;  %v1466_v61 = vpop.f32.mrb[29].mxu1 }
 0x43f   :  { %v1472_v6 = vadd.f32 %v1425_v60, %v2533_v49  ;;  %v1474_v51 = vadd.f32 %v1466_v61, %v2394_v42  ;;  %v1427_v5 = vpop.f32.mrb[14].mxu0  ;;  %v1468_v13 = vpop.f32.mrb[30].mxu1 }
 0x440   :  { %v1839_v57 = vmul.f32 -1.442695, %v1471_v0  ;;  %v1428_v62 = vpop.f32.mrb[15].mxu0  ;;  %v1469_v1 = vpop.f32.mrb[31].mxu1  ;;  %v1841_v54 = vmul.f32 -1.442695, %v1473_v15 }
 0x441   :  { %v1840_v3 = vmul.f32 -1.442695, %v1472_v6 }
 0x442   :  { %2004 = vpow2.f32 %v1839_v57 }
 0x443   :  { %2006 = vpow2.f32 %v1840_v3 }
 0x444   :  { %2008 = vtanh.f32 %v1474_v51 }
 0x445   :  { %2010 = vpow2.f32 %v1841_v54 }
 0x44c   :  { %v2005_v39 = vpop.eup %2004 }
 0x44d   :  { %v1484_v43 = vadd.f32 1.0, %v2005_v39  ;;  %v2007_v44 = vpop.eup %2006 }
 0x44e   :  { %v1485_v45 = vadd.f32 1.0, %v2007_v44  ;;  %v2009_v4 = vpop.eup %2008 }
 0x44f   :  { %2012 = vrcp.f32 %v1484_v43  ;;  %v2011_v8 = vpop.eup %2010 }
 0x450   :  { %2014 = vrcp.f32 %v1485_v45  ;;  %v1486_v11 = vadd.f32 1.0, %v2011_v8 }
 0x452   :  { %2016 = vrcp.f32 %v1486_v11 }
 0x459   :  { %v2013_v42 = vpop.eup %2012 }
 0x45a   :  { %v1495_v9 = vmul.f32 %v2013_v42, %v2009_v4  ;;  %v2015_v10 = vpop.eup %2014 }
 0x45b   :  { %v1494_v12 = vmul.f32 %v2015_v10, %v2486_v36 }
 0x45c   :  { %v2017_v16 = vpop.eup %2016 }
 0x45d   :  { %v1496_v14 = vadd.f32 %v1495_v9, %v1494_v12 }
 0x45f   :  { %2018 = vtanh.f32 %v1496_v14 }
 0x469   :  { %v2019_v17 = vpop.eup %2018 }
 0x46a   :  { %v1498_v18 = vmul.f32 %v2019_v17, %v2017_v16 }
 0x46c   :  { %v1506_v19 = vpack.c.bf16 %v1498_v18, %v2489_v53 }
 0x46e   :  { %1878 = vmatmul.mubr.bf16.vlgmr.msra.gmra.mrb[16].mxu0 %v1506_v19 }
 0x541   :  { %v1879_v21 = vpop.f32.mrb[16].mxu0 }
 0x542   :  { %v1621_v22 = vadd.f32 %v1879_v21, %v1842_v20  ;;  %v1612_v23 = vpop.f32.mrb[17].mxu0 }
 0x543   :  { %v1613_v24 = vadd.f32 %v1842_v20, %v1612_v23  ;;  %v1880_v25 = vpop.f32.mrb[18].mxu0 }
 0x544   :  { %1631 = vmax.xlane.f32.xlu1 %v1621_v22  ;;  %v1615_v26 = vpop.f32.mrb[19].mxu0  ;;  %v1624_v27 = vadd.f32 %v1880_v25, %v1842_v20 }
 0x545   :  { %1627 = vmax.xlane.f32.xlu0 %v1613_v24  ;;  %v1616_v28 = vadd.f32 %v1842_v20, %v1615_v26 }
 0x548   :  { %1633 = vmax.xlane.f32.xlu1 %v1624_v27 }
 0x549   :  { %1629 = vmax.xlane.f32.xlu0 %v1616_v28 }
 0x5d1   :  { %v1632_v29 = vpop.xlane.xlu1 %1631 }
 0x5d2   :  { %v1637_v30 = vsub.f32 %v1621_v22, %v1632_v29  ;;  %v1628_v31 = vpop.xlane.xlu0 %1627 }
 0x5d3   :  { %v1635_v32 = vsub.f32 %v1613_v24, %v1628_v31 }
 0x5d4   :  { %v1643_v35 = vmul.f32 1.442695, %v1637_v30 }
 0x5d5   :  { %v1639_v33 = vmul.f32 1.442695, %v1635_v32  ;;  %v1634_v34 = vpop.xlane.xlu1 %1633 }
 0x5d6   :  { %v1630_v36 = vpop.xlane.xlu0 %1629  ;;  %v1638_v37 = vsub.f32 %v1624_v27, %v1634_v34 }
 0x5d7   :  { %2020 = vpow2.f32 %v1639_v33  ;;  %v1636_v38 = vsub.f32 %v1616_v28, %v1630_v36 }
 0x5d8   :  { %2022 = vpow2.f32 %v1643_v35  ;;  %v1645_v55 = vmul.f32 1.442695, %v1638_v37 }
 0x5d9   :  { %v1641_v53 = vmul.f32 1.442695, %v1636_v38 }
 0x5db   :  { %2024 = vpow2.f32 %v1641_v53 }
 0x5dc   :  { %2026 = vpow2.f32 %v1645_v55 }
 0x5e1   :  { %v2021_v41 = vpop.eup %2020 }
 0x5e2   :  { %1647 = vadd.xlane.f32.xlu0 %v2021_v41  ;;  %v2023_v63 = vpop.eup %2022 }
 0x5e5   :  { %v2025_v7 = vpop.eup %2024 }
 0x5e6   :  { %1651 = vadd.xlane.f32.xlu0 %v2023_v63  ;;  %1649 = vadd.xlane.f32.xlu1 %v2025_v7  ;;  %v2027_v50 = vpop.eup %2026 }
 0x5ea   :  { %1653 = vadd.xlane.f32.xlu1 %v2027_v50 }
 0x66f   :  { %v1648_v46 = vpop.xlane.xlu0 %1647 }
 0x670   :  { %2028 = vlog2.f32 %v1648_v46 }
 0x673   :  { %v1650_v47 = vpop.xlane.xlu1 %1649  ;;  %v1652_v40 = vpop.xlane.xlu0 %1651 }
 0x674   :  { %2030 = vlog2.f32 %v1650_v47 }
 0x675   :  { %2032 = vlog2.f32 %v1652_v40 }
 0x677   :  { %v1654_v48 = vpop.xlane.xlu1 %1653 }
 0x678   :  { %2034 = vlog2.f32 %v1654_v48 }
 0x67a   :  { %v2029_v52 = vpop.eup %2028 }
 0x67b   :  { %v1656_v56 = vmul.f32 0.6931472, %v2029_v52 }
 0x67d   :  { %v1663_v58 = vsub.f32 %v1635_v32, %v1656_v56 }
 0x67e   :  { %v2031_v59 = vpop.eup %2030 }
 0x67f   :  { %v2033_v0 = vpop.eup %2032  ;;  %1667 = vst [vmem:[#allocation10] sm:$0xff] %v1663_v58  ;;  %v1658_v2 = vmul.f32 0.6931472, %v2031_v59 }
 0x680   :  { %v1660_v15 = vmul.f32 0.6931472, %v2033_v0 }
 0x681   :  { %v1664_v60 = vsub.f32 %v1636_v38, %v1658_v2 }
 0x682   :  { %v2035_v61 = vpop.eup %2034  ;;  %v1665_v49 = vsub.f32 %v1637_v30, %v1660_v15 }
 0x683   :  { %1668 = vst [vmem:[#allocation10 + $0x8] sm:$0xff] %v1664_v60  ;;  %v1662_v6 = vmul.f32 0.6931472, %v2035_v61 }
 0x684   :  { %1669 = vst [vmem:[#allocation10 + $0x10] sm:$0xff] %v1665_v49 }
 0x685   :  { %v1666_v51 = vsub.f32 %v1638_v37, %v1662_v6 }
 0x687   :  { %1670 = vst [vmem:[#allocation10 + $0x18] sm:$0xff] %v1666_v51 }
 0x688   :  { %2113 = shalt.err (!%p2110_p0)
}
 0x689   :  { %s2114_s20 = scalar_lea.hbm %s2522_s6, 512 }
 0x68a   :  { %p2115_p1 = scmp.ne.s32.totalorder %s2522_s6, %s2114_s20  ;;  %p2118_p2 = scmp.lt.u32.totalorder %s2114_s20, %s2522_s6 }
 0x68c   :  { %p2120_p3 = pnand %p2118_p2, %p2115_p1 }
 0x68e   :  { %2123 = shalt.err (!%p2120_p3)
}
 0x68f   :  { %s2139_s25 = smov 128   ;;  %s2140_s26 = smov 8  }
 0x690   :  { %1682 = dma.vmem_to_hbm [thread:$0]  %s1677_s16, 512, %s2522_s6, [#allocation6], %s2139_s25, %s2139_s25, %s2140_s26  }
 0x691   :  { %2128 = dma.done.wait [#allocation6], 512  }
 0x692   :  { %2129 = vsyncadd [#allocation6], 4294966784 }
 0x693   :  { %1686 = vsyncpa [#allocation5], 1 }
 0x694   :  { %1687 = vsyncpa [#allocation8], 1 }
 0x695   :  { %1688 = vsyncpa [#allocation6], 1 }

</bundles_post_ra>
